<compile_context>
chip_gen: v7x
topology: tpu7x:2x2x1
jax: 0.10.0
libtpu: 0.0.40
codegen_flags: <defaults>
</compile_context>

<pallas_src>
import functools
import math

import jax
import jax.numpy as jnp
from jax.experimental import pallas as pl
from jax.experimental.pallas import tpu as pltpu

_LOG_2PI = math.log(2.0 * math.pi)
_NEG_BIG = -1e30          # finite "minus infinity" used for mask pixel padding

_VMEM_SPEC = pl.BlockSpec(memory_space=pltpu.MemorySpace.VMEM)
_SMEM_SPEC = pl.BlockSpec(memory_space=pltpu.MemorySpace.SMEM)


def _cdiv(a, b):
    return -(-a // b)


def _round_up(a, b):
    return _cdiv(a, b) * b


# ----------------------------------------------------------------------------
# Kernel 1: fused small scalar losses (single launch, whole-array blocks)
# ----------------------------------------------------------------------------
def _fused_small_losses_kernel(*refs, huber_delta, has_boxes):
    if has_boxes:
        (logits_ref, labels_ref, w_ref, pp_ref, tp_ref, ch_ref, pb_ref, tb_ref,
         cls_ref, nll_ref, lik_ref, hub_ref, l1_ref, giou_ref) = refs
    else:
        (logits_ref, labels_ref, w_ref, pp_ref, tp_ref, ch_ref,
         cls_ref, nll_ref, lik_ref, hub_ref) = refs

    # ---- classification: weighted BCE-with-logits over all queries ----
    x = logits_ref[...].astype(jnp.float32)          # (1, Nq)
    y = labels_ref[...].astype(jnp.float32)
    w = w_ref[...].astype(jnp.float32)
    bce = jnp.maximum(x, 0.0) - x * y + jnp.log1p(jnp.exp(-jnp.abs(x)))
    cls_ref[0, 0] = jnp.mean(w * bce)

    # ---- 2-D MultivariateNormal(mu, scale_tril=L) log_prob (lane-dense) ----
    pp = pp_ref[...].astype(jnp.float32)             # (2, Nm) pred positions
    tp = tp_ref[...].astype(jnp.float32)             # (2, Nm) true positions
    ch = ch_ref[...].astype(jnp.float32)             # (3, Nm) rows = [l11,l21,l22]
    d1 = tp[0:1, :] - pp[0:1, :]
    d2 = tp[1:2, :] - pp[1:2, :]
    l11 = jnp.maximum(ch[0:1, :], 1e-12)             # positivity guard
    l21 = ch[1:2, :]
    l22 = jnp.maximum(ch[2:3, :], 1e-12)
    z1 = d1 / l11
    z2 = (d2 - l21 * z1) / l22
    log_prob = (-0.5 * (z1 * z1 + z2 * z2)
                - jnp.log(l11) - jnp.log(l22) - _LOG_2PI)
    nll_ref[0, 0] = jnp.mean(-log_prob)
    lik_ref[0, 0] = jnp.mean(1.0 - jnp.exp(log_prob))

    # ---- Huber over positions ----
    d = pp - tp
    ad = jnp.abs(d)
    hub = jnp.where(ad <= huber_delta, 0.5 * d * d,
                    huber_delta * (ad - 0.5 * huber_delta))
    hub_ref[0, 0] = jnp.mean(hub)

    # ---- boxes: L1 + diagonal GIoU (lane-dense: rows = [x1,y1,x2,y2]) ----
    if has_boxes:
        pb = pb_ref[...].astype(jnp.float32)         # (4, Nm)
        tb = tb_ref[...].astype(jnp.float32)
        l1_ref[0, 0] = jnp.mean(jnp.abs(pb - tb))
        eps = 1e-7                                   # NaN guard for degenerate boxes
        px1, py1, px2, py2 = pb[0:1], pb[1:2], pb[2:3], pb[3:4]
        tx1, ty1, tx2, ty2 = tb[0:1], tb[1:2], tb[2:3], tb[3:4]
        area_p = (px2 - px1) * (py2 - py1)
        area_t = (tx2 - tx1) * (ty2 - ty1)
        inter = (jnp.maximum(jnp.minimum(px2, tx2) - jnp.maximum(px1, tx1), 0.0)
                 * jnp.maximum(jnp.minimum(py2, ty2) - jnp.maximum(py1, ty1), 0.0))
        union = area_p + area_t - inter
        iou = inter / (union + eps)
        area_c = ((jnp.maximum(px2, tx2) - jnp.minimum(px1, tx1))
                  * (jnp.maximum(py2, ty2) - jnp.minimum(py1, ty1)))
        giou = iou - (area_c - union) / (area_c + eps)
        giou_ref[0, 0] = jnp.mean(1.0 - giou)


def fused_small_losses(logits, labels_f, weights, pp_T, tp_T, ch_T,
                       pb_T=None, tb_T=None, *, huber_delta):
    has_boxes = pb_T is not None
    inputs = [logits, labels_f, weights, pp_T, tp_T, ch_T]
    if has_boxes:
        inputs += [pb_T, tb_T]
    n_out = 6 if has_boxes else 4
    kernel = functools.partial(_fused_small_losses_kernel,
                               huber_delta=float(huber_delta),
                               has_boxes=has_boxes)
    outs = pl.pallas_call(
        kernel,
        in_specs=[_VMEM_SPEC] * len(inputs),
        out_specs=tuple(_SMEM_SPEC for _ in range(n_out)),
        out_shape=tuple(jax.ShapeDtypeStruct((1, 1), jnp.float32)
                        for _ in range(n_out)),
    )(*inputs)
    return tuple(o[0, 0] for o in outs)


# ----------------------------------------------------------------------------
# Kernel 2: segmentation-mask losses (fused BCE + DICE), tiled over rows
# ----------------------------------------------------------------------------
def _mask_losses_kernel(pred_ref, true_ref, bce_ref, dice_ref, *, n_valid, tile_n):
    i = pl.program_id(0)

    @pl.when(i == 0)
    def _():
        bce_ref[0, 0] = 0.0
        dice_ref[0, 0] = 0.0

    x = pred_ref[...].astype(jnp.float32)            # (tile_n, P_pad)
    t = true_ref[...].astype(jnp.float32)
    row_ids = i * tile_n + jax.lax.broadcasted_iota(jnp.int32, (tile_n, 1), 0)
    valid = (row_ids < n_valid).astype(jnp.float32)  # (tile_n, 1) row validity

    # BCE-with-logits; padded pixels (x = -1e30, t = 0) contribute exactly 0.
    bce = jnp.maximum(x, 0.0) - x * t + jnp.log1p(jnp.exp(-jnp.abs(x)))
    bce_ref[0, 0] += jnp.sum(bce * valid)

    # per-row softmax-DICE over the (un-tiled) pixel axis; padded pixels get p=0.
    m = jnp.max(x, axis=-1, keepdims=True)
    e = jnp.exp(x - m)
    p = e / jnp.sum(e, axis=-1, keepdims=True)
    num = jnp.sum(2.0 * p * t, axis=-1, keepdims=True)
    den = jnp.sum(p + t, axis=-1, keepdims=True)
    row_loss = 1.0 - (num + 1.0) / (den + 1.0)
    dice_ref[0, 0] += jnp.sum(row_loss * valid)


def mask_losses(sorted_pred_map, sorted_true_map, *, max_tile_rows=128):
    n, p = sorted_pred_map.shape
    p_pad = _round_up(p, 128)                        # lane-dense pixel axis
    tile_n = min(_round_up(n, 8), max_tile_rows)     # sized for v7x 64 MiB VMEM
    n_pad = _round_up(n, tile_n)
    pred_p = jnp.pad(sorted_pred_map, ((0, n_pad - n), (0, p_pad - p)),
                     constant_values=_NEG_BIG)
    true_p = jnp.pad(sorted_true_map, ((0, n_pad - n), (0, p_pad - p)),
                     constant_values=0.0)
    kernel = functools.partial(_mask_losses_kernel, n_valid=n, tile_n=tile_n)
    bce_sum, dice_sum = pl.pallas_call(
        kernel,
        grid=(n_pad // tile_n,),
        in_specs=[pl.BlockSpec((tile_n, p_pad), lambda i: (i, 0)),
                  pl.BlockSpec((tile_n, p_pad), lambda i: (i, 0))],
        out_specs=(pl.BlockSpec((1, 1), lambda i: (0, 0),
                                memory_space=pltpu.MemorySpace.SMEM),
                   pl.BlockSpec((1, 1), lambda i: (0, 0),
                                memory_space=pltpu.MemorySpace.SMEM)),
        out_shape=(jax.ShapeDtypeStruct((1, 1), jnp.float32),
                   jax.ShapeDtypeStruct((1, 1), jnp.float32)),
        compiler_params=pltpu.CompilerParams(
            dimension_semantics=("arbitrary",),
            vmem_limit_bytes=32 * 1024 * 1024),
    )(pred_p, true_p)
    # divide by true (unpadded) counts in the wrapper
    return bce_sum[0, 0] / (n * p), dice_sum[0, 0] / n


# ----------------------------------------------------------------------------
# Kernel 3: salience sigmoid-focal loss, tiled over a lane-dense slab
# ----------------------------------------------------------------------------
def _focal_sum_kernel(x_ref, t_ref, out_ref, *, n_valid, tile_r, lane, alpha, gamma):
    i = pl.program_id(0)

    @pl.when(i == 0)
    def _():
        out_ref[0, 0] = 0.0

    x = x_ref[...].astype(jnp.float32)               # (tile_r, lane)
    t = t_ref[...].astype(jnp.float32)
    row = jax.lax.broadcasted_iota(jnp.int32, (tile_r, lane), 0)
    col = jax.lax.broadcasted_iota(jnp.int32, (tile_r, lane), 1)
    flat = (i * tile_r + row) * lane + col
    valid = (flat < n_valid).astype(jnp.float32)

    # sigmoid & BCE share exp(-|x|); gamma==2 avoids pow -> less EUP pressure.
    z = jnp.exp(-jnp.abs(x))
    inv = 1.0 / (1.0 + z)
    pos = x >= 0.0
    p = jnp.where(pos, inv, z * inv)                 # == sigmoid(x)
    one_minus_p = jnp.where(pos, z * inv, inv)
    ce = jnp.maximum(x, 0.0) - x * t + jnp.log1p(z)
    one_minus_pt = one_minus_p * t + p * (1.0 - t)   # == 1 - p_t
    if gamma == 2.0:
        mod = one_minus_pt * one_minus_pt
    else:
        mod = one_minus_pt ** gamma
    loss = ce * mod
    if alpha >= 0.0:                                 # torchvision convention
        loss = (alpha * t + (1.0 - alpha) * (1.0 - t)) * loss
    out_ref[0, 0] += jnp.sum(loss * valid)


def salience_focal_loss(fg_logits, targets, *, alpha, gamma,
                        lane=512, max_tile_rows=256):
    e = int(fg_logits.size)
    x = fg_logits.reshape(-1)
    t = targets.reshape(-1)
    rows = _cdiv(e, lane)
    tile_r = min(_round_up(rows, 8), max_tile_rows)
    rows_pad = _round_up(rows, tile_r)
    total = rows_pad * lane
    x = jnp.pad(x, (0, total - e)).reshape(rows_pad, lane)
    t = jnp.pad(t, (0, total - e)).reshape(rows_pad, lane)
    kernel = functools.partial(_focal_sum_kernel, n_valid=e, tile_r=tile_r,
                               lane=lane, alpha=float(alpha), gamma=float(gamma))
    out = pl.pallas_call(
        kernel,
        grid=(rows_pad // tile_r,),
        in_specs=[pl.BlockSpec((tile_r, lane), lambda i: (i, 0)),
                  pl.BlockSpec((tile_r, lane), lambda i: (i, 0))],
        out_specs=pl.BlockSpec((1, 1), lambda i: (0, 0),
                               memory_space=pltpu.MemorySpace.SMEM),
        out_shape=jax.ShapeDtypeStruct((1, 1), jnp.float32),
        compiler_params=pltpu.CompilerParams(
            dimension_semantics=("arbitrary",),
            vmem_limit_bytes=32 * 1024 * 1024),
    )(x, t)
    return out[0, 0] / e


# ----------------------------------------------------------------------------
# Glue (single fused gathers / single-scatter labels) in plain JAX
# ----------------------------------------------------------------------------
def _flat_matched_indices(batch_offsets, per_batch_indices):
    parts = [idx.astype(jnp.int32) + batch_offsets[b].astype(jnp.int32)
             for b, idx in enumerate(per_batch_indices)]
    return jnp.concatenate(parts, axis=0)


def batch_offsets_to_indices(offsets, total):
    idx = jnp.arange(total)
    return jnp.searchsorted(offsets, idx, side="right") - 1


# ----------------------------------------------------------------------------
# LossCalculator
# ----------------------------------------------------------------------------
class LossCalculatorPallas:
    def __init__(self, config):
        self.config = config
        self.loss_weights = config["loss_weights"]

    def apply_loss_weights(self, loss_dict):
        return {k: self.loss_weights[k.replace("loss_", "")] * v
                for k, v in loss_dict.items()}

    def __call__(self, predicted_dict, target_dict, matched_indices):
        cfg = self.config
        loss_dict, extras_dict = {}, {}

        pred_logits = predicted_dict["pred_logits"]
        q_off = predicted_dict["query_batch_offsets"]
        e_off = target_dict["electron_batch_offsets"]
        nq = pred_logits.shape[0]

        # one flat index array per side, one jnp.take per sorted tensor
        pred_flat_idx = _flat_matched_indices(q_off, [m[0] for m in matched_indices])
        true_flat_idx = _flat_matched_indices(e_off, [m[1] for m in matched_indices])

        # ---------------- classification labels / weights (single scatter) ----
        labels = jnp.zeros((nq,), jnp.int32).at[pred_flat_idx].set(1)
        if cfg["standardize_no_electron_weight"]:
            num_pos = labels.sum().astype(jnp.float32)
            neg_w = num_pos / (nq - num_pos)
            weights = jnp.where(labels == 0, neg_w, 1.0).astype(jnp.float32)
        elif cfg["no_electron_weight"] != 1.0:
            weights = jnp.where(labels == 0, cfg["no_electron_weight"],
                                1.0).astype(jnp.float32)
        else:
            weights = jnp.ones((nq,), jnp.float32)
        extras_dict["classification_labels"] = labels

        # ---------------- sorted (matched) tensors ----------------
        sorted_pred_map = jnp.take(predicted_dict["pred_segmentation_logits"],
                                   pred_flat_idx, axis=0)
        sorted_true_map = jnp.take(target_dict["segmentation_mask"],
                                   true_flat_idx, axis=0)
        pred_pos = jnp.take(predicted_dict["pred_positions"], pred_flat_idx, axis=0)
        pred_chol = jnp.take(predicted_dict["pred_std_dev_cholesky"],
                             pred_flat_idx, axis=0)
        true_pos = jnp.take(target_dict["incidence_points_pixels_rc"],
                            true_flat_idx, axis=0)
        centroid_pos = jnp.take(target_dict["centers_of_mass_rc"],
                                true_flat_idx, axis=0)

        # lane-dense transposed layouts (items on the lane axis)
        pp_T = pred_pos.T.astype(jnp.float32)                          # (2, Nm)
        tp_T = true_pos.T.astype(jnp.float32)                          # (2, Nm)
        ch_T = jnp.stack([pred_chol[:, 0, 0], pred_chol[:, 1, 0],
                          pred_chol[:, 1, 1]], axis=0).astype(jnp.float32)  # (3, Nm)

        has_boxes = "pred_boxes" in predicted_dict
        pb_T = tb_T = None
        if has_boxes:
            pred_boxes = predicted_dict["pred_boxes"]
            image_size_xy = jnp.flip(
                target_dict["image_size_pixels_rc"].astype(jnp.float32), -1)
            batch_idx = batch_offsets_to_indices(q_off, pred_boxes.shape[0])
            isz_per_query = image_size_xy[batch_idx]
            norm_pred_boxes = pred_boxes / jnp.concatenate(
                [isz_per_query, isz_per_query], -1)
            pred_boxes_sorted = jnp.take(norm_pred_boxes, pred_flat_idx, axis=0)
            true_boxes_sorted = jnp.take(
                target_dict["bounding_boxes_normalized_xyxy"], true_flat_idx, axis=0)
            pb_T = pred_boxes_sorted.T.astype(jnp.float32)             # (4, Nm)
            tb_T = true_boxes_sorted.T.astype(jnp.float32)

        # ---------------- fused small scalar-loss kernel (one launch) ----------
        # TODO(synk): detach_likelihood_mean only affects gradients, not the forward
        # values; gradient stop is not modeled here.
        outs = fused_small_losses(
            pred_logits.reshape(1, nq).astype(jnp.float32),
            labels.reshape(1, nq).astype(jnp.float32),
            weights.reshape(1, nq),
            pp_T, tp_T, ch_T, pb_T, tb_T,
            huber_delta=cfg["huber_delta"])
        loss_dict["loss_classification"] = outs[0]
        loss_dict["loss_distance_nll"] = outs[1]
        loss_dict["loss_distance_likelihood"] = outs[2]
        loss_dict["loss_distance_huber"] = outs[3]
        if has_boxes:
            loss_dict["loss_box_l1"] = outs[4]
            loss_dict["loss_box_giou"] = outs[5]

        # ---------------- segmentation masks (fused BCE + DICE, tiled) ---------
        # TODO(synk): torch.sparse union_sparse_indices / sparse softmax have no clean
        # Pallas equivalent; segmentation maps are handled as dense (all pixels
        # present), which makes the union the identity.
        bce, dice = mask_losses(sorted_pred_map, sorted_true_map)
        loss_dict["loss_mask_bce"] = bce
        loss_dict["loss_mask_dice"] = dice
        extras_dict["unioned_predicted_mask"] = sorted_pred_map
        extras_dict["unioned_true_mask"] = sorted_true_map

        extras_dict["position_data"] = dict(
            pred_positions=pred_pos, pred_std_cholesky=pred_chol,
            true_positions=true_pos, centroid_positions=centroid_pos,
            image_size_pixels_rc=target_dict["image_size_pixels_rc"])

        # ---------------- salience ----------------
        if "score_dict" in predicted_dict:
            # TODO(synk): ElectronSalienceCriterion.prep_inputs is not available;
            # score_dict is assumed to already hold dense foreground-mask logits and
            # the target the peak-normalized images; sigmoid focal loss applied.
            fg = predicted_dict["score_dict"]["foreground_mask_logits"]
            tgt = target_dict["peak_normalized_images"]
            loss_dict["loss_salience"] = salience_focal_loss(
                fg, tgt, alpha=cfg["salience_alpha"], gamma=cfg["salience_gamma"])

        return loss_dict, extras_dict


# ----------------------------------------------------------------------------
# Example run
# ----------------------------------------------------------------------------
if __name__ == "__main__":
    key = jax.random.PRNGKey(0)
    B = 2
    QUERIES_PER_BATCH = 8
    ELECTRONS_PER_BATCH = 4
    MATCHED_PER_BATCH = 4
    P = 64          # pixels per segmentation window
    H = W = 16

    Nq = B * QUERIES_PER_BATCH
    Ne = B * ELECTRONS_PER_BATCH

    keys = jax.random.split(key, 16)

    # ------- predicted -------
    pred_logits = jax.random.normal(keys[0], (Nq,), jnp.float32)
    pred_positions = jax.random.uniform(keys[1], (Nq, 2), jnp.float32, 0.0, 16.0)
    raw = jax.random.normal(keys[2], (Nq, 3), jnp.float32)
    l11 = jax.nn.softplus(raw[:, 0]) + 0.1
    l22 = jax.nn.softplus(raw[:, 1]) + 0.1
    l21 = 0.1 * raw[:, 2]
    pred_chol = jnp.stack(
        [jnp.stack([l11, jnp.zeros_like(l11)], -1),
         jnp.stack([l21, l22], -1)], axis=1)                # (Nq, 2, 2) lower-tri
    pred_seg_logits = jax.random.normal(keys[3], (Nq, P), jnp.float32)
    x1y1 = jax.random.uniform(keys[4], (Nq, 2), jnp.float32, 0.0, 12.0)
    wh = jax.random.uniform(keys[5], (Nq, 2), jnp.float32, 1.0, 4.0)
    pred_boxes = jnp.concatenate([x1y1, x1y1 + wh], -1)     # pixel xyxy
    fg_logits = jax.random.normal(keys[6], (B, H, W), jnp.float32)

    query_batch_offsets = jnp.array([0, QUERIES_PER_BATCH], jnp.int32)
    electron_batch_offsets = jnp.array([0, ELECTRONS_PER_BATCH], jnp.int32)

    predicted_dict = {
        "pred_logits": pred_logits,
        "query_batch_offsets": query_batch_offsets,
        "pred_segmentation_logits": pred_seg_logits,
        "pred_positions": pred_positions,
        "pred_std_dev_cholesky": pred_chol,
        "pred_boxes": pred_boxes,
        "score_dict": {"foreground_mask_logits": fg_logits},
    }

    # ------- target -------
    true_positions = jax.random.uniform(keys[7], (Ne, 2), jnp.float32, 0.0, 16.0)
    centers_of_mass = true_positions + 0.3 * jax.random.normal(keys[8], (Ne, 2))
    seg_mask = (jax.random.uniform(keys[9], (Ne, P)) < 0.3).astype(jnp.float32)
    tx1y1 = jax.random.uniform(keys[10], (Ne, 2), jnp.float32, 0.0, 0.7)
    twh = jax.random.uniform(keys[11], (Ne, 2), jnp.float32, 0.05, 0.25)
    true_boxes = jnp.concatenate([tx1y1, tx1y1 + twh], -1)   # normalized xyxy
    peak_images = jax.random.uniform(keys[12], (B, H, W), jnp.float32)

    target_dict = {
        "segmentation_mask": seg_mask,
        "incidence_points_pixels_rc": true_positions,
        "centers_of_mass_rc": centers_of_mass,
        "image_size_pixels_rc": jnp.array([[H, W], [H, W]], jnp.float32),
        "electron_batch_offsets": electron_batch_offsets,
        "bounding_boxes_normalized_xyxy": true_boxes,
        "peak_normalized_images": peak_images,
    }

    # matched indices: per batch (pred_query_idx, true_electron_idx)
    matched_indices = []
    for b in range(B):
        perm = jax.random.permutation(keys[13 + b], QUERIES_PER_BATCH)[:MATCHED_PER_BATCH]
        matched_indices.append(
            (perm.astype(jnp.int32), jnp.arange(MATCHED_PER_BATCH, dtype=jnp.int32)))

    config = dict(
        no_electron_weight=0.1,
        standardize_no_electron_weight=False,
        huber_delta=1.0,
        salience_alpha=0.25,
        salience_gamma=2.0,
        detach_likelihood_mean=False,
        predict_box=True,
        loss_weights=dict(classification=1.0, mask_bce=1.0, mask_dice=1.0,
                          distance_nll=0.5, distance_likelihood=0.5,
                          distance_huber=1.0, salience=1.0,
                          box_l1=5.0, box_giou=2.0),
    )

    calc = LossCalculatorPallas(config)
    loss_dict, extras_dict = calc(predicted_dict, target_dict, matched_indices)
    loss_dict = jax.block_until_ready(loss_dict)

    for name, value in loss_dict.items():
        assert bool(jnp.isfinite(value)), f"non-finite loss: {name}"
    weighted = calc.apply_loss_weights(loss_dict)
    _ = jax.block_until_ready(weighted)
    print("KERNEL_OK")
</pallas_src>

<mosaic_0001>
module attributes {stable_mosaic.version = 11 : i64} {
  func.func @_fused_small_losses_kernel(%arg0: memref<1x16xf32, #tpu.memory_space<vmem>>, %arg1: memref<1x16xf32, #tpu.memory_space<vmem>>, %arg2: memref<1x16xf32, #tpu.memory_space<vmem>>, %arg3: memref<2x8xf32, #tpu.memory_space<vmem>>, %arg4: memref<2x8xf32, #tpu.memory_space<vmem>>, %arg5: memref<3x8xf32, #tpu.memory_space<vmem>>, %arg6: memref<4x8xf32, #tpu.memory_space<vmem>>, %arg7: memref<4x8xf32, #tpu.memory_space<vmem>>, %arg8: memref<1x1xf32, #tpu.memory_space<smem>>, %arg9: memref<1x1xf32, #tpu.memory_space<smem>>, %arg10: memref<1x1xf32, #tpu.memory_space<smem>>, %arg11: memref<1x1xf32, #tpu.memory_space<smem>>, %arg12: memref<1x1xf32, #tpu.memory_space<smem>>, %arg13: memref<1x1xf32, #tpu.memory_space<smem>>) attributes {dimension_semantics = [], scalar_prefetch = 0 : i64, scratch_operands = 0 : i64, tpu.core_type = #tpu.core_type<tc>} {
    %c0 = arith.constant 0 : index
    %c0_0 = arith.constant 0 : index
    %0 = vector.load %arg0[%c0, %c0_0] : memref<1x16xf32, #tpu.memory_space<vmem>>, vector<1x16xf32>
    %c0_1 = arith.constant 0 : index
    %c0_2 = arith.constant 0 : index
    %1 = vector.load %arg1[%c0_1, %c0_2] : memref<1x16xf32, #tpu.memory_space<vmem>>, vector<1x16xf32>
    %c0_3 = arith.constant 0 : index
    %c0_4 = arith.constant 0 : index
    %2 = vector.load %arg2[%c0_3, %c0_4] : memref<1x16xf32, #tpu.memory_space<vmem>>, vector<1x16xf32>
    %cst = arith.constant 0.000000e+00 : f32
    %3 = vector.broadcast %cst : f32 to vector<1x16xf32>
    %4 = arith.maximumf %0, %3 : vector<1x16xf32>
    %5 = arith.mulf %0, %1 : vector<1x16xf32>
    %6 = arith.subf %4, %5 : vector<1x16xf32>
    %7 = math.absf %0 : vector<1x16xf32>
    %cst_5 = arith.constant 0.000000e+00 : f32
    %8 = vector.broadcast %cst_5 : f32 to vector<1x16xf32>
    %9 = arith.subf %8, %7 : vector<1x16xf32>
    %10 = math.exp %9 : vector<1x16xf32>
    %11 = math.log1p %10 : vector<1x16xf32>
    %12 = arith.addf %6, %11 : vector<1x16xf32>
    %13 = arith.mulf %2, %12 : vector<1x16xf32>
    %14 = vector.shape_cast %13 : vector<1x16xf32> to vector<1x1x16xf32>
    %cst_6 = arith.constant dense<0.000000e+00> : vector<1xf32>
    %15 = vector.multi_reduction <add>, %14, %cst_6 [1, 2] : vector<1x1x16xf32> to vector<1xf32>
    %16 = vector.shape_cast %15 : vector<1xf32> to vector<1x1x1xf32>
    %17 = vector.extract %16[0, 0, 0] : f32 from vector<1x1x1xf32>
    %cst_7 = arith.constant 1.600000e+01 : f32
    %18 = arith.divf %17, %cst_7 : f32
    %c0_8 = arith.constant 0 : index
    %c0_9 = arith.constant 0 : index
    %19 = memref.load %arg8[%c0_8, %c0_9] : memref<1x1xf32, #tpu.memory_space<smem>>
    memref.store %18, %arg8[%c0_8, %c0_9] : memref<1x1xf32, #tpu.memory_space<smem>>
    %c0_10 = arith.constant 0 : index
    %c0_11 = arith.constant 0 : index
    %20 = vector.load %arg3[%c0_10, %c0_11] : memref<2x8xf32, #tpu.memory_space<vmem>>, vector<2x8xf32>
    %c0_12 = arith.constant 0 : index
    %c0_13 = arith.constant 0 : index
    %21 = vector.load %arg4[%c0_12, %c0_13] : memref<2x8xf32, #tpu.memory_space<vmem>>, vector<2x8xf32>
    %c0_14 = arith.constant 0 : index
    %c0_15 = arith.constant 0 : index
    %22 = vector.load %arg5[%c0_14, %c0_15] : memref<3x8xf32, #tpu.memory_space<vmem>>, vector<3x8xf32>
    %23 = vector.extract_strided_slice %21 {offsets = [0, 0], sizes = [1, 8], strides = [1, 1]} : vector<2x8xf32> to vector<1x8xf32>
    %24 = vector.extract_strided_slice %20 {offsets = [0, 0], sizes = [1, 8], strides = [1, 1]} : vector<2x8xf32> to vector<1x8xf32>
    %25 = arith.subf %23, %24 : vector<1x8xf32>
    %26 = vector.extract_strided_slice %21 {offsets = [1, 0], sizes = [1, 8], strides = [1, 1]} : vector<2x8xf32> to vector<1x8xf32>
    %27 = vector.extract_strided_slice %20 {offsets = [1, 0], sizes = [1, 8], strides = [1, 1]} : vector<2x8xf32> to vector<1x8xf32>
    %28 = arith.subf %26, %27 : vector<1x8xf32>
    %29 = vector.extract_strided_slice %22 {offsets = [0, 0], sizes = [1, 8], strides = [1, 1]} : vector<3x8xf32> to vector<1x8xf32>
    %cst_16 = arith.constant 9.99999996E-13 : f32
    %30 = vector.broadcast %cst_16 : f32 to vector<1x8xf32>
    %31 = arith.maximumf %29, %30 : vector<1x8xf32>
    %32 = vector.extract_strided_slice %22 {offsets = [1, 0], sizes = [1, 8], strides = [1, 1]} : vector<3x8xf32> to vector<1x8xf32>
    %33 = vector.extract_strided_slice %22 {offsets = [2, 0], sizes = [1, 8], strides = [1, 1]} : vector<3x8xf32> to vector<1x8xf32>
    %cst_17 = arith.constant 9.99999996E-13 : f32
    %34 = vector.broadcast %cst_17 : f32 to vector<1x8xf32>
    %35 = arith.maximumf %33, %34 : vector<1x8xf32>
    %36 = arith.divf %25, %31 : vector<1x8xf32>
    %37 = arith.mulf %32, %36 : vector<1x8xf32>
    %38 = arith.subf %28, %37 : vector<1x8xf32>
    %39 = arith.divf %38, %35 : vector<1x8xf32>
    %40 = arith.mulf %36, %36 : vector<1x8xf32>
    %41 = arith.mulf %39, %39 : vector<1x8xf32>
    %42 = arith.addf %40, %41 : vector<1x8xf32>
    %cst_18 = arith.constant -5.000000e-01 : f32
    %43 = vector.broadcast %cst_18 : f32 to vector<1x8xf32>
    %44 = arith.mulf %43, %42 : vector<1x8xf32>
    %45 = math.log %31 : vector<1x8xf32>
    %46 = arith.subf %44, %45 : vector<1x8xf32>
    %47 = math.log %35 : vector<1x8xf32>
    %48 = arith.subf %46, %47 : vector<1x8xf32>
    %cst_19 = arith.constant 1.83787704 : f32
    %49 = vector.broadcast %cst_19 : f32 to vector<1x8xf32>
    %50 = arith.subf %48, %49 : vector<1x8xf32>
    %cst_20 = arith.constant 0.000000e+00 : f32
    %51 = vector.broadcast %cst_20 : f32 to vector<1x8xf32>
    %52 = arith.subf %51, %50 : vector<1x8xf32>
    %53 = vector.shape_cast %52 : vector<1x8xf32> to vector<1x1x8xf32>
    %cst_21 = arith.constant dense<0.000000e+00> : vector<1xf32>
    %54 = vector.multi_reduction <add>, %53, %cst_21 [1, 2] : vector<1x1x8xf32> to vector<1xf32>
    %55 = vector.shape_cast %54 : vector<1xf32> to vector<1x1x1xf32>
    %56 = vector.extract %55[0, 0, 0] : f32 from vector<1x1x1xf32>
    %cst_22 = arith.constant 8.000000e+00 : f32
    %57 = arith.divf %56, %cst_22 : f32
    %c0_23 = arith.constant 0 : index
    %c0_24 = arith.constant 0 : index
    %58 = memref.load %arg9[%c0_23, %c0_24] : memref<1x1xf32, #tpu.memory_space<smem>>
    memref.store %57, %arg9[%c0_23, %c0_24] : memref<1x1xf32, #tpu.memory_space<smem>>
    %59 = math.exp %50 : vector<1x8xf32>
    %cst_25 = arith.constant 1.000000e+00 : f32
    %60 = vector.broadcast %cst_25 : f32 to vector<1x8xf32>
    %61 = arith.subf %60, %59 : vector<1x8xf32>
    %62 = vector.shape_cast %61 : vector<1x8xf32> to vector<1x1x8xf32>
    %cst_26 = arith.constant dense<0.000000e+00> : vector<1xf32>
    %63 = vector.multi_reduction <add>, %62, %cst_26 [1, 2] : vector<1x1x8xf32> to vector<1xf32>
    %64 = vector.shape_cast %63 : vector<1xf32> to vector<1x1x1xf32>
    %65 = vector.extract %64[0, 0, 0] : f32 from vector<1x1x1xf32>
    %cst_27 = arith.constant 8.000000e+00 : f32
    %66 = arith.divf %65, %cst_27 : f32
    %c0_28 = arith.constant 0 : index
    %c0_29 = arith.constant 0 : index
    %67 = memref.load %arg10[%c0_28, %c0_29] : memref<1x1xf32, #tpu.memory_space<smem>>
    memref.store %66, %arg10[%c0_28, %c0_29] : memref<1x1xf32, #tpu.memory_space<smem>>
    %68 = arith.subf %20, %21 : vector<2x8xf32>
    %69 = math.absf %68 : vector<2x8xf32>
    %cst_30 = arith.constant 1.000000e+00 : f32
    %70 = vector.broadcast %cst_30 : f32 to vector<2x8xf32>
    %71 = arith.cmpf ole, %69, %70 : vector<2x8xf32>
    %cst_31 = arith.constant 5.000000e-01 : f32
    %72 = vector.broadcast %cst_31 : f32 to vector<2x8xf32>
    %73 = arith.mulf %72, %68 : vector<2x8xf32>
    %74 = arith.mulf %73, %68 : vector<2x8xf32>
    %cst_32 = arith.constant 5.000000e-01 : f32
    %75 = vector.broadcast %cst_32 : f32 to vector<2x8xf32>
    %76 = arith.subf %69, %75 : vector<2x8xf32>
    %cst_33 = arith.constant 1.000000e+00 : f32
    %77 = vector.broadcast %cst_33 : f32 to vector<2x8xf32>
    %78 = arith.mulf %77, %76 : vector<2x8xf32>
    %79 = arith.select %71, %74, %78 : vector<2x8xi1>, vector<2x8xf32>
    %80 = vector.shape_cast %79 : vector<2x8xf32> to vector<1x2x8xf32>
    %cst_34 = arith.constant dense<0.000000e+00> : vector<1xf32>
    %81 = vector.multi_reduction <add>, %80, %cst_34 [1, 2] : vector<1x2x8xf32> to vector<1xf32>
    %82 = vector.shape_cast %81 : vector<1xf32> to vector<1x1x1xf32>
    %83 = vector.extract %82[0, 0, 0] : f32 from vector<1x1x1xf32>
    %cst_35 = arith.constant 1.600000e+01 : f32
    %84 = arith.divf %83, %cst_35 : f32
    %c0_36 = arith.constant 0 : index
    %c0_37 = arith.constant 0 : index
    %85 = memref.load %arg11[%c0_36, %c0_37] : memref<1x1xf32, #tpu.memory_space<smem>>
    memref.store %84, %arg11[%c0_36, %c0_37] : memref<1x1xf32, #tpu.memory_space<smem>>
    %c0_38 = arith.constant 0 : index
    %c0_39 = arith.constant 0 : index
    %86 = vector.load %arg6[%c0_38, %c0_39] : memref<4x8xf32, #tpu.memory_space<vmem>>, vector<4x8xf32>
    %c0_40 = arith.constant 0 : index
    %c0_41 = arith.constant 0 : index
    %87 = vector.load %arg7[%c0_40, %c0_41] : memref<4x8xf32, #tpu.memory_space<vmem>>, vector<4x8xf32>
    %88 = arith.subf %86, %87 : vector<4x8xf32>
    %89 = math.absf %88 : vector<4x8xf32>
    %90 = vector.shape_cast %89 : vector<4x8xf32> to vector<1x4x8xf32>
    %cst_42 = arith.constant dense<0.000000e+00> : vector<1xf32>
    %91 = vector.multi_reduction <add>, %90, %cst_42 [1, 2] : vector<1x4x8xf32> to vector<1xf32>
    %92 = vector.shape_cast %91 : vector<1xf32> to vector<1x1x1xf32>
    %93 = vector.extract %92[0, 0, 0] : f32 from vector<1x1x1xf32>
    %cst_43 = arith.constant 3.200000e+01 : f32
    %94 = arith.divf %93, %cst_43 : f32
    %c0_44 = arith.constant 0 : index
    %c0_45 = arith.constant 0 : index
    %95 = memref.load %arg12[%c0_44, %c0_45] : memref<1x1xf32, #tpu.memory_space<smem>>
    memref.store %94, %arg12[%c0_44, %c0_45] : memref<1x1xf32, #tpu.memory_space<smem>>
    %96 = vector.extract_strided_slice %86 {offsets = [0, 0], sizes = [1, 8], strides = [1, 1]} : vector<4x8xf32> to vector<1x8xf32>
    %97 = vector.extract_strided_slice %86 {offsets = [1, 0], sizes = [1, 8], strides = [1, 1]} : vector<4x8xf32> to vector<1x8xf32>
    %98 = vector.extract_strided_slice %86 {offsets = [2, 0], sizes = [1, 8], strides = [1, 1]} : vector<4x8xf32> to vector<1x8xf32>
    %99 = vector.extract_strided_slice %86 {offsets = [3, 0], sizes = [1, 8], strides = [1, 1]} : vector<4x8xf32> to vector<1x8xf32>
    %100 = vector.extract_strided_slice %87 {offsets = [0, 0], sizes = [1, 8], strides = [1, 1]} : vector<4x8xf32> to vector<1x8xf32>
    %101 = vector.extract_strided_slice %87 {offsets = [1, 0], sizes = [1, 8], strides = [1, 1]} : vector<4x8xf32> to vector<1x8xf32>
    %102 = vector.extract_strided_slice %87 {offsets = [2, 0], sizes = [1, 8], strides = [1, 1]} : vector<4x8xf32> to vector<1x8xf32>
    %103 = vector.extract_strided_slice %87 {offsets = [3, 0], sizes = [1, 8], strides = [1, 1]} : vector<4x8xf32> to vector<1x8xf32>
    %104 = arith.subf %98, %96 : vector<1x8xf32>
    %105 = arith.subf %99, %97 : vector<1x8xf32>
    %106 = arith.mulf %104, %105 : vector<1x8xf32>
    %107 = arith.subf %102, %100 : vector<1x8xf32>
    %108 = arith.subf %103, %101 : vector<1x8xf32>
    %109 = arith.mulf %107, %108 : vector<1x8xf32>
    %110 = arith.minimumf %98, %102 : vector<1x8xf32>
    %111 = arith.maximumf %96, %100 : vector<1x8xf32>
    %112 = arith.subf %110, %111 : vector<1x8xf32>
    %cst_46 = arith.constant 0.000000e+00 : f32
    %113 = vector.broadcast %cst_46 : f32 to vector<1x8xf32>
    %114 = arith.maximumf %112, %113 : vector<1x8xf32>
    %115 = arith.minimumf %99, %103 : vector<1x8xf32>
    %116 = arith.maximumf %97, %101 : vector<1x8xf32>
    %117 = arith.subf %115, %116 : vector<1x8xf32>
    %cst_47 = arith.constant 0.000000e+00 : f32
    %118 = vector.broadcast %cst_47 : f32 to vector<1x8xf32>
    %119 = arith.maximumf %117, %118 : vector<1x8xf32>
    %120 = arith.mulf %114, %119 : vector<1x8xf32>
    %121 = arith.addf %106, %109 : vector<1x8xf32>
    %122 = arith.subf %121, %120 : vector<1x8xf32>
    %cst_48 = arith.constant 1.000000e-07 : f32
    %123 = vector.broadcast %cst_48 : f32 to vector<1x8xf32>
    %124 = arith.addf %122, %123 : vector<1x8xf32>
    %125 = arith.divf %120, %124 : vector<1x8xf32>
    %126 = arith.maximumf %98, %102 : vector<1x8xf32>
    %127 = arith.minimumf %96, %100 : vector<1x8xf32>
    %128 = arith.subf %126, %127 : vector<1x8xf32>
    %129 = arith.maximumf %99, %103 : vector<1x8xf32>
    %130 = arith.minimumf %97, %101 : vector<1x8xf32>
    %131 = arith.subf %129, %130 : vector<1x8xf32>
    %132 = arith.mulf %128, %131 : vector<1x8xf32>
    %133 = arith.subf %132, %122 : vector<1x8xf32>
    %cst_49 = arith.constant 1.000000e-07 : f32
    %134 = vector.broadcast %cst_49 : f32 to vector<1x8xf32>
    %135 = arith.addf %132, %134 : vector<1x8xf32>
    %136 = arith.divf %133, %135 : vector<1x8xf32>
    %137 = arith.subf %125, %136 : vector<1x8xf32>
    %cst_50 = arith.constant 1.000000e+00 : f32
    %138 = vector.broadcast %cst_50 : f32 to vector<1x8xf32>
    %139 = arith.subf %138, %137 : vector<1x8xf32>
    %140 = vector.shape_cast %139 : vector<1x8xf32> to vector<1x1x8xf32>
    %cst_51 = arith.constant dense<0.000000e+00> : vector<1xf32>
    %141 = vector.multi_reduction <add>, %140, %cst_51 [1, 2] : vector<1x1x8xf32> to vector<1xf32>
    %142 = vector.shape_cast %141 : vector<1xf32> to vector<1x1x1xf32>
    %143 = vector.extract %142[0, 0, 0] : f32 from vector<1x1x1xf32>
    %cst_52 = arith.constant 8.000000e+00 : f32
    %144 = arith.divf %143, %cst_52 : f32
    %c0_53 = arith.constant 0 : index
    %c0_54 = arith.constant 0 : index
    %145 = memref.load %arg13[%c0_53, %c0_54] : memref<1x1xf32, #tpu.memory_space<smem>>
    memref.store %144, %arg13[%c0_53, %c0_54] : memref<1x1xf32, #tpu.memory_space<smem>>
    return
  }
}

</mosaic_0001>

<bundles_post_ra>
// kernel: tpu_custom_call.1
= control target key start
LH: loop header
LB: loop body
LE: loop exit
PB: predicated region body
PF: predicated region fallthrough
CT: control target
= control target key end

     0   :  { %19 = vsyncpa [#allocation3], 0  ;;  %s759_s0 = inlined_call_operand.hbm [shape: f32[1,16], index: 0, kind: input, shape index: {}]   ;;  %s760_s1 = inlined_call_operand.vmem [shape: f32[1,16], index: 1, kind: input, shape index: {}]   ;;  %s761_s2 = inlined_call_operand.hbm [shape: f32[1,16], index: 2, kind: input, shape index: {}]   ;;  %s762_s3 = inlined_call_operand.vmem [shape: f32[2,8], index: 3, kind: input, shape index: {}]   ;;  %s763_s4 = inlined_call_operand.hbm [shape: f32[2,8], index: 4, kind: input, shape index: {}]   ;;  %s764_s5 = inlined_call_operand.vmem [shape: f32[3,8], index: 5, kind: input, shape index: {}]   ;;  %s765_s6 = inlined_call_operand.vmem [shape: f32[4,8], index: 6, kind: input, shape index: {}]   ;;  %s766_s7 = inlined_call_operand.vmem [shape: f32[4,8], index: 7, kind: input, shape index: {}]   ;;  %s767_s8 = inlined_call_operand.hbm [shape: f32[1,1], index: 8, kind: output, shape index: {0}]   ;;  %s768_s9 = inlined_call_operand.hbm [shape: f32[1,1], index: 9, kind: output, shape index: {1}]   ;;  %s769_s10 = inlined_call_operand.hbm [shape: f32[1,1], index: 10, kind: output, shape index: {2}]   ;;  %s770_s11 = inlined_call_operand.hbm [shape: f32[1,1], index: 11, kind: output, shape index: {3}]   ;;  %s771_s12 = inlined_call_operand.hbm [shape: f32[1,1], index: 12, kind: output, shape index: {4}]   ;;  %s772_s13 = inlined_call_operand.hbm [shape: f32[1,1], index: 13, kind: output, shape index: {5}]  }
   0x1   :  { %20 = vsyncpa [#allocation6], 0 }
   0x2   :  { %21 = vsyncpa [#allocation4], 0 }
   0x3   :  { %22 = vsyncpa [#allocation10], 0 }
   0x4   :  { %23 = vsyncpa [#allocation13], 0 }
   0x5   :  { %24 = vsyncpa [#allocation16], 0  ;;  %s535_s25 = smov [#allocation5]   ;;  %s536_s27 = smov [#allocation2]  }
   0x6   :  { %s43_s26 = sshll.u32 %s535_s25, 4  ;;  %s31_s28 = sshll.u32 %s536_s27, 4  ;;  %s44_s26 = int_to_ptr.vmem [resolvable:$true] %s43_s26  ;;  %s32_s28 = int_to_ptr.vmem [resolvable:$true] %s31_s28 }
   0x7   :  { %s397_s14 = scalar_lea.hbm %s761_s2, 16 }
   0x8   :  { %p398_p0 = scmp.ne.s32.totalorder %s761_s2, %s397_s14  ;;  %p401_p1 = scmp.lt.u32.totalorder %s397_s14, %s761_s2 }
   0xa   :  { %p403_p2 = pnand %p401_p1, %p398_p0 }
   0xc   :  { %406 = shalt.err (!%p403_p2)
}
   0xd   :  { %s407_s19 = scalar_lea.vmem %s44_s26, 16  ;;  %s411_s20 = scalar_lea.vmem %s44_s26, 32 }
   0xe   :  { %p408_p3 = scmp.ne.s32.totalorder %s44_s26, %s407_s19  ;;  %p412_p4 = scmp.lt.s32.totalorder %s44_s26, %s44_s26 }
   0xf   :  { %p413_p5 = scmp.lt.s32.totalorder %s411_s20, %s407_s19 }
  0x11   :  { %p414_p6 = por %p413_p5, %p412_p4 }
  0x13   :  { %p415_p7 = pnand %p414_p6, %p408_p3 }
  0x15   :  { %418 = shalt.err (!%p415_p7)
}
  0x16   :  { %46 = dma.hbm_to_vmem [thread:$0]  %s761_s2, 16, %s44_s26, [#allocation6]  }
  0x17   :  { %s419_s25 = scalar_lea.hbm %s759_s0, 16 }
  0x18   :  { %p420_p8 = scmp.ne.s32.totalorder %s759_s0, %s419_s25  ;;  %p423_p9 = scmp.lt.u32.totalorder %s419_s25, %s759_s0 }
  0x1a   :  { %p425_p10 = pnand %p423_p9, %p420_p8 }
  0x1c   :  { %428 = shalt.err (!%p425_p10)
}
  0x1d   :  { %s429_s15 = scalar_lea.vmem %s32_s28, 16  ;;  %s433_s16 = scalar_lea.vmem %s32_s28, 32 }
  0x1e   :  { %p430_p11 = scmp.ne.s32.totalorder %s32_s28, %s429_s15  ;;  %p434_p12 = scmp.lt.s32.totalorder %s32_s28, %s32_s28 }
  0x1f   :  { %p435_p13 = scmp.lt.s32.totalorder %s433_s16, %s429_s15 }
  0x21   :  { %p436_p0 = por %p435_p13, %p434_p12 }
  0x23   :  { %p437_p1 = pnand %p436_p0, %p430_p11 }
  0x25   :  { %440 = shalt.err (!%p437_p1)
}
  0x26   :  { %34 = dma.hbm_to_vmem [thread:$0]  %s759_s0, 16, %s32_s28, [#allocation3]  }
  0x27   :  { %s537_s17 = smov [#allocation7]   ;;  %s441_s21 = scalar_lea.hbm %s763_s4, 32 }
  0x28   :  { %s55_s18 = sshll.u32 %s537_s17, 4  ;;  %p442_p2 = scmp.ne.s32.totalorder %s763_s4, %s441_s21  ;;  %s56_s18 = int_to_ptr.vmem [resolvable:$true] %s55_s18 }
  0x29   :  { %p445_p3 = scmp.lt.u32.totalorder %s441_s21, %s763_s4 }
  0x2b   :  { %p447_p4 = pnand %p445_p3, %p442_p2 }
  0x2d   :  { %450 = shalt.err (!%p447_p4)
}
  0x2e   :  { %s451_s27 = scalar_lea.vmem %s56_s18, 32  ;;  %p456_p6 = scmp.lt.s32.totalorder %s56_s18, %s56_s18 }
  0x2f   :  { %p452_p5 = scmp.ne.s32.totalorder %s56_s18, %s451_s27  ;;  %p457_p7 = scmp.lt.s32.totalorder %s451_s27, %s451_s27 }
  0x31   :  { %p458_p8 = por %p457_p7, %p456_p6 }
  0x33   :  { %p459_p9 = pnand %p458_p8, %p452_p5 }
  0x35   :  { %462 = shalt.err (!%p459_p9)
}
  0x36   :  { %58 = dma.hbm_to_vmem [thread:$0]  %s763_s4, 32, %s56_s18, [#allocation6]  }
  0x37   :  { %523 = dma.done.wait [#allocation3], 16  }
  0x38   :  { %524 = vsyncadd [#allocation3], 4294967280 }
  0x39   :  { %525 = dma.done.wait [#allocation6], 48  }
  0x3a   :  { %526 = vsyncadd [#allocation6], 4294967248  ;;  %v111_v0 = vld [vmem:[%s762_s3] sm:$0x3]  ;;  %v112_v1 = vld [vmem:[#allocation7] sm:$0x3] }
  0x3b   :  { %v113_v2 = vld [vmem:[%s764_s5] sm:$0x7]  ;;  %v178_v4 = vsub.f32 %v111_v0, %v112_v1  ;;  %vm185_vm0 = vcmask 58368   ;;  %v114_v27 = vsub.f32 %v112_v1, %v111_v0  ;;  %vm95_vm3 = vcmask 122880   ;;  %s463_s20 = scalar_lea.hbm %s767_s8, 16 }
  0x3c   :  { %v115_v3 = vmax.f32 %v113_v2, 1e-12  ;;  %v656_v5 = vld [vmem:[#allocation2] sm:$0x1]  ;;  %vm144_vm4 = vcmask 57344   ;;  %vm205_vm5 = vcmask 60416   ;;  %p464_p10 = scmp.ne.s32.totalorder %s767_s8, %s463_s20  ;;  %p467_p11 = scmp.lt.u32.totalorder %s463_s20, %s767_s8 }
  0x3d   :  { %v80_v6 = vand.u32 2147483647, %v656_v5  ;;  %v179_v7 = vand.u32 2147483647, %v178_v4  ;;  %v181_v8 = vmul.f32 0.5, %v178_v4  ;;  %v77_v59 = vmax.f32 %v656_v5, 0.0 }
  0x3e   :  { %381 = vrcp.f32 %v115_v3  ;;  %v662_v9 = vld [vmem:[%s765_s6] sm:$0xf]  ;;  %v124_v15 = vrot.slane %v115_v3, 1  ;;  %p469_p12 = pnand %p467_p11, %p464_p10 }
  0x3f   :  { %v81_v10 = vsub.f32 0.0, %v80_v6  ;;  %v667_v11 = vld [vmem:[%s766_s7] sm:$0xf]  ;;  %v222_v12 = vrot.slane %v662_v9, 6  ;;  %vm180_vm1 = vcmp.le.f32.partialorder %v179_v7, 1.0  ;;  %v182_v13 = vmul.f32 %v181_v8, %v178_v4 }
  0x40   :  { %v359_v14 = vadd.f32 -0.5, %v179_v7  ;;  %v230_v17 = vrot.slane %v667_v11, 6  ;;  %v237_v20 = vmin.f32 %v662_v9, %v667_v11  ;;  %v238_v21 = vmax.f32 %v662_v9, %v667_v11  ;;  %v75_v53 = vld [vmem:[%s760_s1] sm:$0x1]  ;;  %v76_v7 = vld [vmem:[#allocation5] sm:$0x1] }
  0x41   :  { %v82_v16 = vmul.f32 1.442695, %v81_v10  ;;  %v224_v18 = vsub.f32 %v662_v9, %v222_v12  ;;  %v78_v60 = vmul.f32 %v75_v53, %v656_v5 }
  0x42   :  { %v184_v19 = vsel %vm180_vm1, %v182_v13, %v359_v14  ;;  %v232_v24 = vsub.f32 %v667_v11, %v230_v17  ;;  %v240_v25 = vrot.slane %v238_v21, 6  ;;  %v254_v26 = vrot.slane %v237_v20, 6 }
  0x43   :  { %v186_v22 = vsel %vm185_vm0, %v184_v19, 0.0  ;;  %383 = vpow2.f32 %v82_v16  ;;  %v226_v23 = vrot.slane %v224_v18, 1  ;;  %v203_v17 = vsub.f32 %v662_v9, %v667_v11 }
  0x44   :  { %187 = vadd.xlane.f32.xlu1 %v186_v22  ;;  %385 = vrcp.f32 %v124_v15  ;;  %v234_v29 = vrot.slane %v232_v24, 1  ;;  %v242_v30 = vsub.f32 %v237_v20, %v240_v25  ;;  %v256_v31 = vsub.f32 %v238_v21, %v254_v26 }
  0x45   :  { %v228_v28 = vmul.f32 %v226_v23, %v224_v18  ;;  %387 = vlog2.f32 %v115_v3  ;;  %v79_v3 = vsub.f32 %v77_v59, %v78_v60 }
  0x46   :  { %v236_v33 = vmul.f32 %v234_v29, %v232_v24  ;;  %v243_v34 = vmax.f32 %v242_v30, 0.0  ;;  %v258_v35 = vrot.slane %v256_v31, 1  ;;  %v204_v24 = vand.u32 2147483647, %v203_v17 }
  0x48   :  { %v382_v32 = vpop.eup %381  ;;  %v245_v37 = vrot.slane %v243_v34, 1  ;;  %v248_v38 = vadd.f32 %v236_v33, %v228_v28  ;;  %v260_v41 = vmul.f32 %v258_v35, %v256_v31  ;;  %v206_v26 = vsel %vm205_vm5, %v204_v24, 0.0 }
  0x49   :  { %v117_v36 = vmul.f32 %v382_v32, %v114_v27 }
  0x4a   :  { %v247_v40 = vmul.f32 %v245_v37, %v243_v34  ;;  %v262_v48 = vadd.f32 1e-07, %v260_v41 }
  0x4b   :  { %v119_v39 = vrot.slane %v117_v36, 7  ;;  %v128_v54 = vmul.f32 %v117_v36, %v117_v36 }
  0x4c   :  { %v249_v46 = vsub.f32 %v248_v38, %v247_v40 }
  0x4d   :  { %v384_v42 = vpop.eup %383  ;;  %v121_v43 = vmul.f32 %v119_v39, %v113_v2 }
  0x4e   :  { %v386_v44 = vpop.eup %385  ;;  %v84_v45 = vadd.f32 1.0, %v384_v42  ;;  %v87_v49 = vmul.f32 -0.5, %v384_v42  ;;  %v250_v51 = vadd.f32 1e-07, %v249_v46  ;;  %v90_v61 = vand.u32 2147483647, %v384_v42 }
  0x4f   :  { %v122_v47 = vsub.f32 %v114_v27, %v121_v43  ;;  %v388_v52 = vpop.eup %387  ;;  %v261_v14 = vsub.f32 %v260_v41, %v249_v46 }
  0x50   :  { %389 = vlog2.f32 %v84_v45  ;;  %v88_v56 = vadd.f32 1.0, %v87_v49  ;;  %v136_v58 = vmul.f32 0.6931472, %v388_v52  ;;  %vm91_vm2 = vcmp.lt.f32.partialorder %v90_v61, 0.0004427343 }
  0x51   :  { %v127_v50 = vmul.f32 %v386_v44, %v122_v47  ;;  %391 = vrcp.f32 %v262_v48 }
  0x52   :  { %393 = vrcp.f32 %v250_v51  ;;  %v89_v63 = vmul.f32 %v384_v42, %v88_v56  ;;  %v139_v1 = vrot.slane %v136_v58, 2 }
  0x53   :  { %v129_v55 = vmul.f32 %v127_v50, %v127_v50 }
  0x55   :  { %v131_v57 = vrot.slane %v129_v55, 1 }
  0x57   :  { %v133_v62 = vadd.f32 %v131_v57, %v128_v54 }
  0x59   :  { %v134_v0 = vmul.f32 -0.5, %v133_v62 }
  0x5a   :  { %v390_v2 = vpop.eup %389 }
  0x5b   :  { %v86_v4 = vmul.f32 0.6931472, %v390_v2  ;;  %v137_v6 = vsub.f32 %v134_v0, %v136_v58  ;;  %v392_v12 = vpop.eup %391 }
  0x5c   :  { %v394_v15 = vpop.eup %393  ;;  %v264_v22 = vmul.f32 %v392_v12, %v261_v14 }
  0x5d   :  { %v92_v8 = vsel %vm91_vm2, %v89_v63, %v86_v4  ;;  %v141_v10 = vsub.f32 %v137_v6, %v139_v1  ;;  %v252_v21 = vmul.f32 %v394_v15, %v247_v40 }
  0x5e   :  { %v93_v13 = vadd.f32 %v92_v8, %v79_v3 }
  0x5f   :  { %v358_v16 = vadd.f32 -1.837877, %v141_v10  ;;  %v265_v25 = vsub.f32 %v252_v21, %v264_v22 }
  0x60   :  { %v94_v5 = vmul.f32 %v93_v13, %v76_v7 }
  0x61   :  { %v143_v18 = vsub.f32 0.0, %v358_v16  ;;  %v160_v19 = vmul.f32 1.442695, %v358_v16  ;;  %v266_v27 = vsub.f32 1.0, %v265_v25 }
  0x62   :  { %v96_v20 = vsel %vm95_vm3, %v94_v5, 0.0 }
  0x63   :  { %97 = vadd.xlane.f32.xlu0 %v96_v20  ;;  %395 = vpow2.f32 %v160_v19  ;;  %v145_v23 = vsel %vm144_vm4, %v143_v18, 0.0  ;;  %v268_v9 = vrot.slane %v266_v27, 2 }
  0x65   :  { %v270_v30 = vsel %vm144_vm4, %v268_v9, 0.0 }
  0x67   :  { %146 = vadd.xlane.f32.xlu0 %v145_v23 }
  0x6b   :  { %207 = vadd.xlane.f32.xlu0 %v206_v26 }
  0x6d   :  { %v396_v28 = vpop.eup %395 }
  0x6e   :  { %v162_v29 = vsub.f32 1.0, %v396_v28 }
  0x70   :  { %v163_v11 = vsel %vm144_vm4, %v162_v29, 0.0 }
  0x71   :  { %164 = vadd.xlane.f32.xlu1 %v163_v11 }
  0x75   :  { %271 = vadd.xlane.f32.xlu1 %v270_v30 }
  0xd1   :  { %v188_v33 = vpop.xlane.xlu1 %187 }
  0xd2   :  { %v189_v38 = vrot.slane %v188_v33, 4 }
  0xd4   :  { %v190_v45 = vadd.f32 %v189_v38, %v188_v33 }
  0xd6   :  { %v191_v50 = vrot.slane %v190_v45, 2 }
  0xd8   :  { %v192_v57 = vadd.f32 %v191_v50, %v190_v45 }
  0xda   :  { %v193_v63 = vrot.slane %v192_v57, 1 }
  0xdc   :  { %v194_v6 = vadd.f32 %v193_v63, %v192_v57 }
  0xf0   :  { %v98_v31 = vpop.xlane.xlu0 %97 }
  0xf1   :  { %v99_v32 = vrot.slane %v98_v31, 4 }
  0xf3   :  { %v100_v34 = vadd.f32 %v99_v32, %v98_v31 }
  0xf4   :  { %v147_v35 = vpop.xlane.xlu0 %146 }
  0xf5   :  { %v101_v36 = vrot.slane %v100_v34, 2  ;;  %v148_v37 = vrot.slane %v147_v35, 4 }
  0xf7   :  { %v149_v39 = vadd.f32 %v148_v37, %v147_v35  ;;  %v102_v40 = vadd.f32 %v101_v36, %v100_v34 }
  0xf8   :  { %v208_v41 = vpop.xlane.xlu0 %207 }
  0xf9   :  { %v150_v42 = vrot.slane %v149_v39, 2  ;;  %v209_v43 = vrot.slane %v208_v41, 4  ;;  %v103_v44 = vrot.slane %v102_v40, 1 }
  0xfb   :  { %v210_v46 = vadd.f32 %v209_v43, %v208_v41  ;;  %v104_v47 = vadd.f32 %v103_v44, %v102_v40  ;;  %v151_v48 = vadd.f32 %v150_v42, %v149_v39 }
  0xfd   :  { %360 = vpush %v104_v47  ;;  %v152_v49 = vrot.slane %v151_v48, 1  ;;  %v211_v52 = vrot.slane %v210_v46, 2 }
  0xfe   :  { %v165_v51 = vpop.xlane.xlu1 %164 }
  0xff   :  { %v166_v53 = vrot.slane %v165_v51, 4  ;;  %v153_v54 = vadd.f32 %v152_v49, %v151_v48  ;;  %v212_v58 = vadd.f32 %v211_v52, %v210_v46 }
 0x101   :  { %v167_v55 = vadd.f32 %v166_v53, %v165_v51  ;;  %362 = vpush %v153_v54  ;;  %v213_v2 = vrot.slane %v212_v58, 1 }
 0x102   :  { %v272_v56 = vpop.xlane.xlu1 %271 }
 0x103   :  { %v168_v59 = vrot.slane %v167_v55, 2  ;;  %v273_v60 = vrot.slane %v272_v56, 4  ;;  %v214_v7 = vadd.f32 %v213_v2, %v212_v58 }
 0x105   :  { %v274_v61 = vadd.f32 %v273_v60, %v272_v56  ;;  %v169_v62 = vadd.f32 %v168_v59, %v167_v55 }
 0x107   :  { %v275_v0 = vrot.slane %v274_v61, 2  ;;  %v170_v1 = vrot.slane %v169_v62, 1 }
 0x109   :  { %v276_v3 = vadd.f32 %v275_v0, %v274_v61  ;;  %v171_v4 = vadd.f32 %v170_v1, %v169_v62 }
 0x10b   :  { %364 = vpush %v171_v4  ;;  %v277_v8 = vrot.slane %v276_v3, 1 }
 0x10c   :  { %366 = vpush %v194_v6 }
 0x10d   :  { %368 = vpush %v214_v7  ;;  %v278_v10 = vadd.f32 %v277_v8, %v276_v3 }
 0x10f   :  { %370 = vpush %v278_v10 }
 0x12e   :  { %s361_s1 = spop %360 }
 0x12f   :  { %s108_s7 = smul.f32 0.0625, %s361_s1 }
 0x131   :  { %110 = sst [smem:[#allocation8]] %s108_s7 }
 0x132   :  { %s363_s26 = spop %362 }
 0x133   :  { %s157_s17 = smul.f32 0.125, %s363_s26 }
 0x134   :  { %472 = shalt.err (!%p469_p12)
}
 0x135   :  { %s538_s25 = smov [#allocation8]   ;;  %159 = sst [smem:[#allocation9]] %s157_s17 }
 0x136   :  { %292 = dma.smem_to_hbm %s538_s25, 16, %s767_s8, [#allocation4]  }
 0x137   :  { %s473_s30 = scalar_lea.hbm %s768_s9, 16 }
 0x138   :  { %p474_p13 = scmp.ne.s32.totalorder %s768_s9, %s473_s30  ;;  %p477_p0 = scmp.lt.u32.totalorder %s473_s30, %s768_s9 }
 0x13a   :  { %p479_p1 = pnand %p477_p0, %p474_p13 }
 0x13c   :  { %482 = shalt.err (!%p479_p1)
}
 0x13d   :  { %s539_s3 = smov [#allocation9]   ;;  %s365_s8 = spop %364 }
 0x13e   :  { %300 = dma.smem_to_hbm %s539_s3, 16, %s768_s9, [#allocation10]  }
 0x13f   :  { %s175_s6 = smul.f32 0.125, %s365_s8  ;;  %s367_s1 = spop %366 }
 0x140   :  { %s198_s7 = smul.f32 0.0625, %s367_s1  ;;  %s369_s26 = spop %368 }
 0x141   :  { %177 = sst [smem:[#allocation11]] %s175_s6  ;;  %s218_s17 = smul.f32 0.03125, %s369_s26 }
 0x142   :  { %s371_s18 = spop %370  ;;  %200 = sst [smem:[#allocation12]] %s198_s7 }
 0x143   :  { %220 = sst [smem:[#allocation14]] %s218_s17  ;;  %s282_s19 = smul.f32 0.125, %s371_s18 }
 0x144   :  { %s483_s22 = scalar_lea.hbm %s770_s11, 16 }
 0x145   :  { %p484_p2 = scmp.ne.s32.totalorder %s770_s11, %s483_s22  ;;  %p487_p3 = scmp.lt.u32.totalorder %s483_s22, %s770_s11 }
 0x147   :  { %p489_p4 = pnand %p487_p3, %p484_p2 }
 0x149   :  { %492 = shalt.err (!%p489_p4)
}
 0x14a   :  { %s540_s27 = smov [#allocation12]   ;;  %s493_s14 = scalar_lea.hbm %s769_s10, 16 }
 0x14b   :  { %316 = dma.smem_to_hbm %s540_s27, 16, %s770_s11, [#allocation13]  }
 0x14c   :  { %p494_p5 = scmp.ne.s32.totalorder %s769_s10, %s493_s14  ;;  %p497_p6 = scmp.lt.u32.totalorder %s493_s14, %s769_s10 }
 0x14e   :  { %p499_p7 = pnand %p497_p6, %p494_p5 }
 0x150   :  { %502 = shalt.err (!%p499_p7)
}
 0x151   :  { %s541_s2 = smov [#allocation11]   ;;  %s503_s1 = scalar_lea.hbm %s771_s12, 16 }
 0x152   :  { %308 = dma.smem_to_hbm %s541_s2, 16, %s769_s10, [#allocation10]  }
 0x153   :  { %p504_p8 = scmp.ne.s32.totalorder %s771_s12, %s503_s1  ;;  %p507_p9 = scmp.lt.u32.totalorder %s503_s1, %s771_s12 }
 0x155   :  { %p509_p10 = pnand %p507_p9, %p504_p8 }
 0x157   :  { %512 = shalt.err (!%p509_p10)
}
 0x158   :  { %s542_s20 = smov [#allocation14]   ;;  %284 = sst [smem:[#allocation15]] %s282_s19 }
 0x159   :  { %324 = dma.smem_to_hbm %s542_s20, 16, %s771_s12, [#allocation13]  }
 0x15a   :  { %s513_s24 = scalar_lea.hbm %s772_s13, 16 }
 0x15b   :  { %p514_p11 = scmp.ne.s32.totalorder %s772_s13, %s513_s24  ;;  %p517_p12 = scmp.lt.u32.totalorder %s513_s24, %s772_s13 }
 0x15d   :  { %p519_p13 = pnand %p517_p12, %p514_p11 }
 0x15f   :  { %522 = shalt.err (!%p519_p13)
}
 0x160   :  { %s543_s28 = smov [#allocation15]  }
 0x161   :  { %332 = dma.smem_to_hbm %s543_s28, 16, %s772_s13, [#allocation16]  }
 0x162   :  { %527 = dma.done.wait [#allocation4], 16  }
 0x163   :  { %528 = vsyncadd [#allocation4], 4294967280 }
 0x164   :  { %529 = dma.done.wait [#allocation10], 32  }
 0x165   :  { %530 = vsyncadd [#allocation10], 4294967264 }
 0x166   :  { %531 = dma.done.wait [#allocation13], 32  }
 0x167   :  { %532 = vsyncadd [#allocation13], 4294967264 }
 0x168   :  { %533 = dma.done.wait [#allocation16], 16  }
 0x169   :  { %534 = vsyncadd [#allocation16], 4294967280 }
 0x16a   :  { %351 = sfence }
 0x16b   :  { %352 = vsyncpa [#allocation3], 1 }
 0x16c   :  { %353 = vsyncpa [#allocation6], 1 }
 0x16d   :  { %354 = vsyncpa [#allocation4], 1 }
 0x16e   :  { %355 = vsyncpa [#allocation10], 1 }
 0x16f   :  { %356 = vsyncpa [#allocation13], 1 }
 0x170   :  { %357 = vsyncpa [#allocation16], 1 }

</bundles_post_ra>
